<compile_context>
chip_gen: v7x
topology: tpu7x:2x2x1
jax: 0.10.0
libtpu: 0.0.40
codegen_flags: <defaults>
</compile_context>

<pallas_src>
import jax
import jax.numpy as jnp
from jax.experimental import pallas as pl
from jax.experimental.pallas import tpu as pltpu


def _conv1x1_kernel(x_ref, w_ref, o_ref):
    # x_ref: (bn, Cin, tp)   pixel tile of bn batch elements (lane dim = pixels)
    # w_ref: (tn, Cin)       resident weight tile
    # o_ref: (bn, tn, tp)    output tile (lane dim = pixels)
    w = w_ref[...]
    for b in range(x_ref.shape[0]):          # bn is small & static -> unrolled
        o_ref[b] = jnp.dot(
            w, x_ref[b], preferred_element_type=jnp.float32
        ).astype(o_ref.dtype)


def _round_down_128(v):
    return (v // 128) * 128


def _select_tiles(N, Cin, Cout, HW, x_item, w_item, o_item, budget):
    """Pick (bn, tp, tn) so each grid step moves >= ~1 MiB of activations and all
    (double-buffered) blocks fit inside `budget` bytes of VMEM."""
    target = 1 << 20          # aim for >= ~1 MiB of activation bytes per grid step
    margin = 2 << 20          # headroom for Mosaic-internal scratch

    def need(bn, tp, tn):
        return (2 * bn * Cin * tp * x_item       # activation blocks (double buffered)
                + 2 * bn * tn * tp * o_item      # output blocks
                + 2 * tn * Cin * w_item          # weight block
                + bn * tn * tp * 4               # fp32 matmul result before the cast
                + margin)

    # --- pixel / batch block --------------------------------------------------
    if HW <= 4096 and Cin * HW * x_item <= 2 * target:
        # Small feature map: whole spatial extent per block, batch several images
        # per grid step to amortize the ~0.35us per-step overhead.
        tp = HW
        bn = int(max(1, min(target // max(1, Cin * HW * x_item), N, 8)))
    else:
        bn = 1
        tp = max(128, min(4096, _round_down_128(target // max(1, Cin * x_item))))
        if tp > HW:
            tp = HW

    # --- channel (Cout) block -------------------------------------------------
    # Prefer full weight residency (tn == Cout): activations are then read from HBM
    # exactly once.  Shrink bn, then tp, before giving that up.
    tn = Cout
    while need(bn, tp, tn) > budget and bn > 1:
        bn //= 2
    while need(bn, tp, tn) > budget and tp > 128:
        tp = max(128, _round_down_128(tp // 2))
    while need(bn, tp, tn) > budget and tn > 128:
        tn = max(128, _round_down_128(tn // 2))
    # TODO(synk): tile Cin (reduction axis + fp32 VMEM accumulator) for the extreme
    # case where even (bn=1, tp=128, tn=128) blocks overflow the VMEM budget.

    # If Cout had to be tiled, regrow the pixel tile: the weight block is small now
    # and large pixel tiles keep the (HBM-bound) DMAs efficient.
    if tn < Cout:
        while tp < min(HW, 4096):
            new_tp = min(tp * 2, 4096)
            if new_tp >= HW:
                new_tp = HW
            if need(bn, new_tp, tn) > budget:
                break
            tp = new_tp

    return bn, tp, tn, need(bn, tp, tn)


def conv1x1(x_nchw, weight_oihw):
    """1x1 convolution, stride 1, no bias (== nn.Conv2d(Cin, Cout, 1, bias=False)).

    x_nchw:      (N, Cin, H, W)
    weight_oihw: (Cout, Cin, 1, 1)   PyTorch Conv2d weight layout
    returns:     (N, Cout, H, W)
    """
    N, Cin, H, W = x_nchw.shape
    Cout = weight_oihw.shape[0]
    HW = H * W

    x = x_nchw.reshape(N, Cin, HW)        # free reshape, no data movement
    w = weight_oihw.reshape(Cout, Cin)

    x_item = jnp.dtype(x_nchw.dtype).itemsize
    w_item = jnp.dtype(weight_oihw.dtype).itemsize
    o_item = x_item

    # Generation-aware VMEM budget with ~25% headroom (v7x: 64 MiB/TC, v5e/v6e: 128 MiB).
    try:
        vmem_cap = int(pltpu.get_tpu_info().vmem_capacity_bytes)
    except Exception:
        vmem_cap = 64 << 20               # conservative fallback (v7x per-TC VMEM)
    budget = (vmem_cap * 3) // 4

    bn, tp, tn, vmem_need = _select_tiles(
        N, Cin, Cout, HW, x_item, w_item, o_item, budget)

    nb = pl.cdiv(N, bn)
    pb = pl.cdiv(HW, tp)
    jb = pl.cdiv(Cout, tn)
    # Cout (when tiled) is the innermost grid axis so the activation tile stays
    # resident across it and only the small (tn, Cin) weight tile is re-fetched.
    grid = (nb, pb, jb)
    # TODO(synk): when N == 1 and jb == 1 on v7x, prefer an even `pb` so the grid
    # shards evenly across the 2 TensorCores.

    # Request what we actually need (+ fixed margin already inside vmem_need); no 2x.
    vmem_limit = int(min(max(vmem_need, 32 << 20), budget + (4 << 20)))

    # Exact(ish) HBM traffic: activations read once; weights re-read per outer step
    # only when Cout is tiled (partial trailing blocks ignored).
    bytes_accessed = (N * Cin * HW * x_item
                      + N * Cout * HW * o_item
                      + Cout * Cin * w_item * (nb * pb if jb > 1 else 1))
    cost = pl.CostEstimate(
        flops=2 * N * HW * Cin * Cout,
        transcendentals=0,
        bytes_accessed=int(bytes_accessed),
    )

    out = pl.pallas_call(
        _conv1x1_kernel,
        out_shape=jax.ShapeDtypeStruct((N, Cout, HW), x_nchw.dtype),
        grid_spec=pltpu.PrefetchScalarGridSpec(
            num_scalar_prefetch=0,
            grid=grid,
            in_specs=[
                # activations: constant along the innermost (Cout) axis -> stay resident
                pl.BlockSpec((bn, Cin, tp), lambda n, p, j: (n, 0, p)),
                # weights: constant along batch/pixel axes; re-fetched only when Cout
                # is tiled (innermost axis).
                # TODO(synk): pipeline_mode=pl.Buffered(1) here when jb == 1 to reclaim
                # the second weight buffer for a larger pixel tile (v7x VMEM).
                pl.BlockSpec((tn, Cin), lambda n, p, j: (j, 0)),
            ],
            out_specs=pl.BlockSpec((bn, tn, tp), lambda n, p, j: (n, j, p)),
        ),
        compiler_params=pltpu.CompilerParams(
            # Every output block is written exactly once; the Cout axis stays
            # "arbitrary" so megacore sharding never duplicates activation DMAs.
            dimension_semantics=("parallel", "parallel", "arbitrary"),
            vmem_limit_bytes=vmem_limit,
        ),
        cost_estimate=cost,
    )(x, w)

    return out.reshape(N, Cout, H, W)


if __name__ == "__main__":
    key = jax.random.PRNGKey(0)
    k_x, k_w, k_x2, k_w2 = jax.random.split(key, 4)

    # --- module-sized check: N=2, Cin=4, Cout=8, 16x16 (small-map, batched path) ---
    N, Cin, Cout, H, W = 2, 4, 8, 16, 16
    x = jax.random.normal(k_x, (N, Cin, H, W), dtype=jnp.float32)
    bound = 1.0 / (Cin ** 0.5)      # Conv2d kaiming-uniform bound, fan_in = Cin * 1 * 1
    weight = jax.random.uniform(
        k_w, (Cout, Cin, 1, 1), dtype=jnp.float32, minval=-bound, maxval=bound)

    y = jax.block_until_ready(conv1x1(x, weight))
    y_ref = jnp.einsum("nchw,oc->nohw", x, weight.reshape(Cout, Cin))
    assert y.shape == (N, Cout, H, W)
    assert jnp.allclose(y, y_ref, atol=1e-4, rtol=1e-4)

    # --- larger spatial map: exercises the 128-aligned pixel-tiling path with a
    #     partial trailing pixel block ---
    N2, Cin2, Cout2, H2, W2 = 1, 8, 16, 96, 96
    x2 = jax.random.normal(k_x2, (N2, Cin2, H2, W2), dtype=jnp.float32)
    bound2 = 1.0 / (Cin2 ** 0.5)
    weight2 = jax.random.uniform(
        k_w2, (Cout2, Cin2, 1, 1), dtype=jnp.float32, minval=-bound2, maxval=bound2)

    y2 = jax.block_until_ready(conv1x1(x2, weight2))
    y2_ref = jnp.einsum("nchw,oc->nohw", x2, weight2.reshape(Cout2, Cin2))
    assert y2.shape == (N2, Cout2, H2, W2)
    assert jnp.allclose(y2, y2_ref, atol=1e-4, rtol=1e-4)

    print("KERNEL_OK")
</pallas_src>

<mosaic_0001>
module attributes {stable_mosaic.version = 11 : i64} {
  func.func @_conv1x1_kernel(%arg0: i32, %arg1: i32, %arg2: i32, %arg3: memref<2x4x256xf32, #tpu.memory_space<vmem>>, %arg4: memref<8x4xf32, #tpu.memory_space<vmem>>, %arg5: memref<2x8x256xf32, #tpu.memory_space<vmem>>) attributes {dimension_semantics = [#tpu.dimension_semantics<parallel>, #tpu.dimension_semantics<parallel>, #tpu.dimension_semantics<arbitrary>], iteration_bounds = array<i64: 1, 1, 1>, scalar_prefetch = 0 : i64, scratch_operands = 0 : i64, tpu.core_type = #tpu.core_type<tc>, window_params = [{transform_indices = @transform_0, window_bounds = array<i64: 2, 4, 256>}, {transform_indices = @transform_1, window_bounds = array<i64: 8, 4>}, {transform_indices = @transform_2, window_bounds = array<i64: 2, 8, 256>}]} {
    %c0 = arith.constant 0 : index
    %c0_0 = arith.constant 0 : index
    %0 = vector.load %arg4[%c0, %c0_0] : memref<8x4xf32, #tpu.memory_space<vmem>>, vector<8x4xf32>
    %c0_1 = arith.constant 0 : index
    %c0_2 = arith.constant 0 : index
    %c0_3 = arith.constant 0 : index
    %1 = vector.load %arg3[%c0_1, %c0_2, %c0_3] : memref<2x4x256xf32, #tpu.memory_space<vmem>>, vector<1x4x256xf32>
    %2 = vector.shape_cast %1 : vector<1x4x256xf32> to vector<4x256xf32>
    %cst = arith.constant dense<0.000000e+00> : vector<8x256xf32>
    %3 = tpu.matmul %0, %2, %cst {dimension_numbers = #tpu.dot_dimension_numbers<[1], [0], [0], [1], [0, 0, 1, 1], [], []>} : vector<8x4xf32>, vector<4x256xf32>, vector<8x256xf32> -> vector<8x256xf32>
    %c0_4 = arith.constant 0 : index
    %c0_5 = arith.constant 0 : index
    %c0_6 = arith.constant 0 : index
    %4 = vector.load %arg5[%c0_4, %c0_5, %c0_6] : memref<2x8x256xf32, #tpu.memory_space<vmem>>, vector<1x8x256xf32>
    %5 = vector.shape_cast %4 : vector<1x8x256xf32> to vector<8x256xf32>
    %6 = vector.shape_cast %3 : vector<8x256xf32> to vector<1x8x256xf32>
    tpu.vector_store %arg5[%c0_4, %c0_5, %c0_6], %6 {strides = array<i32>} : memref<2x8x256xf32, #tpu.memory_space<vmem>>, vector<1x8x256xf32>,
    %c1 = arith.constant 1 : index
    %c0_7 = arith.constant 0 : index
    %c0_8 = arith.constant 0 : index
    %7 = vector.load %arg3[%c1, %c0_7, %c0_8] : memref<2x4x256xf32, #tpu.memory_space<vmem>>, vector<1x4x256xf32>
    %8 = vector.shape_cast %7 : vector<1x4x256xf32> to vector<4x256xf32>
    %cst_9 = arith.constant dense<0.000000e+00> : vector<8x256xf32>
    %9 = tpu.matmul %0, %8, %cst_9 {dimension_numbers = #tpu.dot_dimension_numbers<[1], [0], [0], [1], [0, 0, 1, 1], [], []>} : vector<8x4xf32>, vector<4x256xf32>, vector<8x256xf32> -> vector<8x256xf32>
    %c1_10 = arith.constant 1 : index
    %c0_11 = arith.constant 0 : index
    %c0_12 = arith.constant 0 : index
    %10 = vector.load %arg5[%c1_10, %c0_11, %c0_12] : memref<2x8x256xf32, #tpu.memory_space<vmem>>, vector<1x8x256xf32>
    %11 = vector.shape_cast %10 : vector<1x8x256xf32> to vector<8x256xf32>
    %12 = vector.shape_cast %9 : vector<8x256xf32> to vector<1x8x256xf32>
    tpu.vector_store %arg5[%c1_10, %c0_11, %c0_12], %12 {strides = array<i32>} : memref<2x8x256xf32, #tpu.memory_space<vmem>>, vector<1x8x256xf32>,
    return
  }
  func.func @transform_0(%arg0: i32, %arg1: i32, %arg2: i32) -> (i32, i32, i32) {
    %c0_i32 = arith.constant 0 : i32
    %c0_i32_0 = arith.constant 0 : i32
    return %arg0, %c0_i32, %arg1 : i32, i32, i32
  }
  func.func @transform_1(%arg0: i32, %arg1: i32, %arg2: i32) -> (i32, i32) {
    %c0_i32 = arith.constant 0 : i32
    %c0_i32_0 = arith.constant 0 : i32
    return %arg2, %c0_i32 : i32, i32
  }
  func.func @transform_2(%arg0: i32, %arg1: i32, %arg2: i32) -> (i32, i32, i32) {
    %c0_i32 = arith.constant 0 : i32
    return %arg0, %arg2, %arg1 : i32, i32, i32
  }
}

</mosaic_0001>

<bundles_post_ra>
// kernel: tpu_custom_call.1
= control target key start
LH: loop header
LB: loop body
LE: loop exit
PB: predicated region body
PF: predicated region fallthrough
CT: control target
= control target key end

     0   :  { %7 = vsyncpa [#allocation3], 0  ;;  %s323_s0 = inlined_call_operand.hbm [shape: f32[2,4,256], index: 0, kind: input, shape index: {}]   ;;  %s324_s1 = inlined_call_operand.vmem [shape: f32[8,4], index: 1, kind: input, shape index: {}]   ;;  %s325_s2 = inlined_call_operand.hbm [shape: f32[2,8,256], index: 2, kind: output, shape index: {}]  }
   0x1   :  { %8 = vsyncpa [#allocation4], 0  ;;  %s274_s9 = smov [#allocation2]   ;;  %s226_s13 = scalar_lea.hbm %s323_s0, 256 }
   0x2   :  { %s14_s10 = sshll.u32 %s274_s9, 4  ;;  %p227_p0 = scmp.ne.s32.totalorder %s323_s0, %s226_s13  ;;  %s15_s10 = int_to_ptr.vmem [resolvable:$true] %s14_s10 }
   0x3   :  { %p230_p1 = scmp.lt.u32.totalorder %s226_s13, %s323_s0 }
   0x5   :  { %p232_p2 = pnand %p230_p1, %p227_p0 }
   0x7   :  { %235 = shalt.err (!%p232_p2)
}
   0x8   :  { %s236_s18 = scalar_lea.vmem %s15_s10, 256  ;;  %p241_p4 = scmp.lt.s32.totalorder %s15_s10, %s15_s10 }
   0x9   :  { %p237_p3 = scmp.ne.s32.totalorder %s15_s10, %s236_s18  ;;  %p242_p5 = scmp.lt.s32.totalorder %s236_s18, %s236_s18 }
   0xb   :  { %p243_p6 = por %p242_p5, %p241_p4 }
   0xd   :  { %p244_p7 = pnand %p243_p6, %p237_p3 }
   0xf   :  { %247 = shalt.err (!%p244_p7)
}
  0x10   :  { %s275_s19 = smov 128   ;;  %s276_s20 = smov 8  }
  0x11   :  { %20 = dma.hbm_to_vmem [thread:$0]  %s323_s0, 256, %s15_s10, [#allocation3], %s275_s19, %s275_s19, %s276_s20  }
  0x12   :  { %270 = dma.done.wait [#allocation3], 256  }
  0x13   :  { %271 = vsyncadd [#allocation3], 4294967040  ;;  %v277_v0 = vmov 0.0   ;;  %v27_v1 = vld [vmem:[#allocation2] sm:$0xff]  ;;  %vm34_vm0 = vcmask 1043456   ;;  %v113_v2 = vld [vmem:[#allocation2 + $0x8] sm:$0xff] }
  0x14   :  { %103 = vmatprep.mubr.f32.mxu0 %v277_v0  ;;  %184 = vmatprep.mubr.f32.mxu1 %v277_v0  ;;  %v29_v3 = vcombine.high %v27_v1, %v27_v1  ;;  %v115_v4 = vcombine.high %v113_v2, %v113_v2  ;;  %v26_v5 = vld [vmem:[%s324_s1] sm:$0xff]  ;;  %vm30_vm1 = vcmask 31744   ;;  %s278_s0 = smov [#allocation5]  }
  0x15   :  { %s199_s25 = sshll.u32 %s278_s0, 4  ;;  %s200_s25 = int_to_ptr.vmem [resolvable:$true] %s199_s25 }
  0x16   :  { %211 = vmatprep.subr.msk.mxu0 %vm34_vm0, %v29_v3  ;;  %214 = vmatprep.subr.msk.mxu1 %vm34_vm0, %v115_v4  ;;  %s248_s26 = scalar_lea.vmem %s200_s25, 512  ;;  %p253_p9 = scmp.lt.s32.totalorder %s200_s25, %s200_s25 }
  0x17   :  { %212 = vmatpush1.msk.msra.mxu0 %vm34_vm0, %v27_v1  ;;  %215 = vmatpush1.msk.msra.mxu1 %vm34_vm0, %v113_v2  ;;  %p249_p8 = scmp.ne.s32.totalorder %s200_s25, %s248_s26  ;;  %p254_p10 = scmp.lt.s32.totalorder %s248_s26, %s248_s26 }
  0x18   :  { %213 = vmatmul.mubr.msk.f32.vlgmr.msra.gmra.mrb[0].mxu0 %vm30_vm1, %v26_v5  ;;  %216 = vmatmul.mubr.msk.f32.vlgmr.msra.gmra.mrb[0].mxu1 %vm30_vm1, %v26_v5 }
  0x19   :  { %p255_p11 = por %p254_p10, %p253_p9 }
  0x1b   :  { %p256_p12 = pnand %p255_p11, %p249_p8 }
  0xeb   :  { %v105_v6 = vpop.f32.mrb[0].mxu0  ;;  %v186_v7 = vpop.f32.mrb[0].mxu1 }
  0xec   :  { %110 = vst [vmem:[#allocation5] sm:$0xff] %v105_v6  ;;  %192 = vst [vmem:[#allocation5 + $0x10] sm:$0xff] %v186_v7  ;;  %v107_v8 = vpop.f32.mrb[1].mxu0  ;;  %v188_v9 = vpop.f32.mrb[1].mxu1 }
  0xed   :  { %111 = vst [vmem:[#allocation5 + $0x8] sm:$0xff] %v107_v8  ;;  %193 = vst [vmem:[#allocation5 + $0x18] sm:$0xff] %v188_v9 }
  0xee   :  { %259 = shalt.err (!%p256_p12)
}
  0xef   :  { %s260_s28 = scalar_lea.hbm %s325_s2, 512 }
  0xf0   :  { %p261_p13 = scmp.ne.s32.totalorder %s325_s2, %s260_s28  ;;  %p264_p0 = scmp.lt.u32.totalorder %s260_s28, %s325_s2 }
  0xf2   :  { %p266_p1 = pnand %p264_p0, %p261_p13 }
  0xf4   :  { %269 = shalt.err (!%p266_p1)
}
  0xf5   :  { %s279_s5 = smov 256   ;;  %s280_s6 = smov 16  }
  0xf6   :  { %205 = dma.vmem_to_hbm [thread:$0]  %s200_s25, 512, %s325_s2, [#allocation4], %s279_s5, %s279_s5, %s280_s6  }
  0xf7   :  { %272 = dma.done.wait [#allocation4], 512  }
  0xf8   :  { %273 = vsyncadd [#allocation4], 4294966784 }
  0xf9   :  { %209 = vsyncpa [#allocation3], 1 }
  0xfa   :  { %210 = vsyncpa [#allocation4], 1 }

</bundles_post_ra>
